<compile_context>
chip_gen: v6e
topology: v6e:2x2x1
jax: 0.10.0
libtpu: 0.0.40
codegen_flags: <defaults>
</compile_context>

<pallas_src>
import functools

import jax
import jax.numpy as jnp
from jax.experimental import pallas as pl
from jax.experimental.pallas import tpu as pltpu


def _make_conv_kernel(K: int, Cin_p: int, Cout: int, Wp: int, Lout: int,
                      compute_dtype):
    """Conv over a row-major flattened spatial axis, one image per grid step.

    x_ref:    (1, Cin_p, Lin)       flattened reflect-padded (upsampled) input
    w_ref:    (Cout, K*K*Cin_p)     lane-dense weights, w[co, (kh*K+kw)*Cin_p + ci]
    b_ref:    (Cout, 1)             bias (f32)
    o_ref:    (1, Cout, Lout)       flattened output rows (width Wp incl. K-1 garbage cols)
    cols_ref: (K*K*Cin_p, Lout) f32 VMEM im2col staging block
    """

    def conv_kernel(x_ref, w_ref, b_ref, o_ref, cols_ref):
        # Load the flat image once; all tap slices are cheap static lane-offset
        # slices of this value (offsets are lane-misaligned; the shift work is
        # paid once per tap while staging the im2col block, not per matmul).
        xf = x_ref[0].astype(jnp.float32)                     # (Cin_p, Lin)

        # Stage the K*K taps into the im2col scratch.  Row offsets t*Cin_p are
        # multiples of 8, so every store is a tile-aligned (8, Lout) f32 block
        # (scratch kept f32 to avoid packed sub-tile sublane stores; the staging
        # round-trip is VMEM-local and tiny relative to the matmul).
        for kh in range(K):
            for kw in range(K):
                t = kh * K + kw
                off = kh * Wp + kw                            # out[q] uses in[q + off]
                cols_ref[t * Cin_p:(t + 1) * Cin_p, :] = xf[:, off:off + Lout]

        # Single contraction-(K*K*Cin_p) matmul on bf16 operands, f32 accumulate.
        # NOTE: with Cout=8 only 8 MXU result rows are used; for larger channel
        # counts tile Cout to the MXU M dimension (128 on v5e, 256 on v6e/v7x).
        cols = cols_ref[...].astype(compute_dtype)            # (K*K*Cin_p, Lout)
        y = jnp.dot(w_ref[...], cols,
                    preferred_element_type=jnp.float32)       # (Cout, Lout) f32

        # Bias add fused into the single output pass; dense, lane-aligned store.
        o_ref[0] = (y + b_ref[...]).astype(o_ref.dtype)

    return conv_kernel


def upsample_conv_forward(x_nchw, weight_oihw, bias, *, kernel_size, stride=1,
                          upsample=None, compute_dtype=jnp.bfloat16):
    """Equivalent of UpsampleConv.forward for NCHW input (NCHW output)."""
    K = kernel_size
    pad = K // 2
    out_dtype = x_nchw.dtype

    x = x_nchw
    if upsample:
        # F.interpolate(mode='nearest', scale_factor=u) with integer u == repeat.
        # TODO(synk): fuse the nearest-upsample + reflect pad into the kernel via
        # sub-pixel decomposition (s^2 phase convs on the original-resolution
        # input) to drop this s^2-sized HBM intermediate entirely.
        s = int(upsample)
        x = jnp.repeat(jnp.repeat(x, s, axis=2), s, axis=3)

    # ReflectionPad2d(pad) — matches PyTorch (edge not repeated).
    x = jnp.pad(x, ((0, 0), (0, 0), (pad, pad), (pad, pad)), mode="reflect")

    N, Cin, Hp, Wp = x.shape
    Cout = weight_oihw.shape[0]
    Ho1 = Hp - K + 1                      # stride-1 output rows
    Wo1 = Wp - K + 1                      # stride-1 output cols
    Ho = (Hp - K) // stride + 1
    Wo = (Wp - K) // stride + 1

    # Channel pad to a full f32 sublane tile so every im2col store is aligned.
    Cin_p = ((Cin + 7) // 8) * 8
    # Lane-dense flattened sizes: round the output length up to a 128 multiple
    # (unmasked full-width stores); size the input so every tap slice is in bounds.
    Lout = ((Ho1 * Wp + 127) // 128) * 128
    Lin = Lout + (K - 1) * (Wp + 1)

    # Flatten spatial dims row-major, zero-pad channels + tail, and cast to the
    # compute dtype so the (possibly s^2-sized) intermediate costs half the HBM
    # bytes in the default bf16 path.  XLA fuses repeat+pad+reshape+pad+cast into
    # one producer pass; the zero tail only feeds discarded output positions.
    x = jnp.pad(x, ((0, 0), (0, Cin_p - Cin), (0, 0), (0, 0)))
    x_flat = jnp.pad(x.reshape(N, Cin_p, Hp * Wp),
                     ((0, 0), (0, 0), (0, Lin - Hp * Wp))).astype(compute_dtype)

    # Weights as one lane-dense 2D block: w2[co, (kh*K+kw)*Cin_p + ci]
    # (padded channels carry zero weights; padded input channels are zero too).
    w_pad = jnp.pad(weight_oihw, ((0, 0), (0, Cin_p - Cin), (0, 0), (0, 0)))
    w2 = jnp.transpose(w_pad, (0, 2, 3, 1)).reshape(Cout, K * K * Cin_p)
    w2 = w2.astype(compute_dtype)
    b2 = bias.reshape(Cout, 1).astype(jnp.float32)

    kernel = _make_conv_kernel(K, Cin_p, Cout, Wp, Lout, compute_dtype)

    flops = 2 * N * Cout * (K * K * Cin_p) * Lout
    bytes_accessed = (x_flat.size * x_flat.dtype.itemsize
                      + w2.size * w2.dtype.itemsize
                      + b2.size * 4
                      + N * Cout * Lout * jnp.dtype(out_dtype).itemsize)

    # grid=(N,) parallel: with N>=2 both v7x TensorCores are busy; per-step VMEM
    # (input ~20 KiB bf16, output ~37 KiB f32, scratch ~330 KiB) is far under the
    # default scoped VMEM limit on all generations.
    # TODO(synk): for realistic image sizes add a parallel output-row-tile grid
    # axis (halo'd input windows via manual DMA) and set vmem_limit_bytes, sizing
    # tiles per generation (v7x: 64 MiB physical / 32 MiB default scoped, 2 TCs).
    out_flat = pl.pallas_call(
        kernel,
        out_shape=jax.ShapeDtypeStruct((N, Cout, Lout), out_dtype),
        grid=(N,),
        in_specs=[
            pl.BlockSpec((1, Cin_p, Lin), lambda n: (n, 0, 0)),
            pl.BlockSpec((Cout, K * K * Cin_p), lambda n: (0, 0)),
            pl.BlockSpec((Cout, 1), lambda n: (0, 0)),
        ],
        out_specs=pl.BlockSpec((1, Cout, Lout), lambda n: (n, 0, 0)),
        scratch_shapes=[pltpu.VMEM((K * K * Cin_p, Lout), jnp.float32)],
        compiler_params=pltpu.CompilerParams(
            dimension_semantics=("parallel",)),
        cost_estimate=pl.CostEstimate(flops=flops, transcendentals=0,
                                      bytes_accessed=bytes_accessed),
    )(x_flat, w2, b2)

    # Drop the padded tail / wrap-around columns; output is already NCHW.
    # TODO(synk): stride>1 is computed at stride 1 and subsampled here; bake the
    # stride into the output indexing if stride!=1 is ever used in practice.
    out = out_flat[:, :, :Ho1 * Wp].reshape(N, Cout, Ho1, Wp)
    out = out[:, :, ::stride, 0:Wo1:stride]
    assert out.shape == (N, Cout, Ho, Wo)
    return out


def _reference_forward(x_nchw, weight_oihw, bias, *, kernel_size, stride, upsample):
    pad = kernel_size // 2
    x = x_nchw
    if upsample:
        s = int(upsample)
        x = jnp.repeat(jnp.repeat(x, s, axis=2), s, axis=3)
    x = jnp.pad(x, ((0, 0), (0, 0), (pad, pad), (pad, pad)), mode="reflect")
    y = jax.lax.conv_general_dilated(
        x, weight_oihw, window_strides=(stride, stride), padding="VALID",
        dimension_numbers=("NCHW", "OIHW", "NCHW"))
    return y + bias[None, :, None, None]


if __name__ == "__main__":
    # Module config (synthetic, deterministic init — no checkpoint).
    in_channels, out_channels = 4, 8
    kernel_size, stride, upsample = 3, 1, 2

    key = jax.random.PRNGKey(0)
    kx, kw, kb = jax.random.split(key, 3)

    # Input: NCHW, batch=2, channels=4, spatial=16x16.
    x = jax.random.normal(kx, (2, in_channels, 16, 16), dtype=jnp.float32)

    # Conv2d parameter shapes: weight (Cout, Cin, K, K), bias (Cout,).
    fan_in = in_channels * kernel_size * kernel_size
    bound = 1.0 / (fan_in ** 0.5)
    weight = jax.random.uniform(
        kw, (out_channels, in_channels, kernel_size, kernel_size),
        minval=-bound, maxval=bound, dtype=jnp.float32)
    bias = jax.random.uniform(kb, (out_channels,), minval=-bound, maxval=bound,
                              dtype=jnp.float32)

    ref = _reference_forward(x, weight, bias, kernel_size=kernel_size,
                             stride=stride, upsample=upsample)

    # Default path: bf16 operands, f32 accumulation (MXU-native on all chips).
    fwd_bf16 = jax.jit(functools.partial(
        upsample_conv_forward, kernel_size=kernel_size, stride=stride,
        upsample=upsample, compute_dtype=jnp.bfloat16))
    out_bf16 = jax.block_until_ready(fwd_bf16(x, weight, bias))
    assert out_bf16.shape == ref.shape == (2, out_channels, 32, 32), (
        out_bf16.shape, ref.shape)
    assert jnp.max(jnp.abs(out_bf16 - ref)) < 5e-2

    # Strict-numerics path: identical kernel, f32 operands, 1e-4 check.
    fwd_f32 = jax.jit(functools.partial(
        upsample_conv_forward, kernel_size=kernel_size, stride=stride,
        upsample=upsample, compute_dtype=jnp.float32))
    out_f32 = jax.block_until_ready(fwd_f32(x, weight, bias))
    assert jnp.max(jnp.abs(out_f32 - ref)) < 1e-4

    print("KERNEL_OK")
</pallas_src>

<mosaic_0001>
module attributes {stable_mosaic.version = 11 : i64} {
  func.func @conv_kernel(%arg0: i32, %arg1: memref<1x8x1222xbf16, #tpu.memory_space<vmem>>, %arg2: memref<8x72xbf16, #tpu.memory_space<vmem>>, %arg3: memref<8x1xf32, #tpu.memory_space<vmem>>, %arg4: memref<1x8x1152xf32, #tpu.memory_space<vmem>>, %arg5: memref<72x1152xf32, #tpu.memory_space<vmem>>) attributes {dimension_semantics = [#tpu.dimension_semantics<parallel>], iteration_bounds = array<i64: 2>, scalar_prefetch = 0 : i64, scratch_operands = 1 : i64, tpu.core_type = #tpu.core_type<tc>, window_params = [{transform_indices = @transform_0, window_bounds = array<i64: 1, 8, 1222>}, {pipeline_mode = #tpu.pipeline_mode<synchronous>, transform_indices = @transform_1, window_bounds = array<i64: 8, 72>}, {pipeline_mode = #tpu.pipeline_mode<synchronous>, transform_indices = @transform_2, window_bounds = array<i64: 8, 1>}, {transform_indices = @transform_3, window_bounds = array<i64: 1, 8, 1152>}]} {
    %c0 = arith.constant 0 : index
    %c0_0 = arith.constant 0 : index
    %c0_1 = arith.constant 0 : index
    %0 = vector.load %arg1[%c0, %c0_0, %c0_1] : memref<1x8x1222xbf16, #tpu.memory_space<vmem>>, vector<1x8x1222xbf16>
    %1 = vector.shape_cast %0 : vector<1x8x1222xbf16> to vector<8x1222xbf16>
    %2 = arith.extf %1 : vector<8x1222xbf16> to vector<8x1222xf32>
    %3 = vector.extract_strided_slice %2 {offsets = [0, 0], sizes = [8, 1152], strides = [1, 1]} : vector<8x1222xf32> to vector<8x1152xf32>
    %c0_2 = arith.constant 0 : index
    %c0_3 = arith.constant 0 : index
    %4 = vector.load %arg5[%c0_2, %c0_3] : memref<72x1152xf32, #tpu.memory_space<vmem>>, vector<8x1152xf32>
    tpu.vector_store %arg5[%c0_2, %c0_3], %3 {strides = array<i32>} : memref<72x1152xf32, #tpu.memory_space<vmem>>, vector<8x1152xf32>,
    %5 = vector.extract_strided_slice %2 {offsets = [0, 1], sizes = [8, 1152], strides = [1, 1]} : vector<8x1222xf32> to vector<8x1152xf32>
    %c8 = arith.constant 8 : index
    %c0_4 = arith.constant 0 : index
    %6 = vector.load %arg5[%c8, %c0_4] : memref<72x1152xf32, #tpu.memory_space<vmem>>, vector<8x1152xf32>
    tpu.vector_store %arg5[%c8, %c0_4], %5 {strides = array<i32>} : memref<72x1152xf32, #tpu.memory_space<vmem>>, vector<8x1152xf32>,
    %7 = vector.extract_strided_slice %2 {offsets = [0, 2], sizes = [8, 1152], strides = [1, 1]} : vector<8x1222xf32> to vector<8x1152xf32>
    %c16 = arith.constant 16 : index
    %c0_5 = arith.constant 0 : index
    %8 = vector.load %arg5[%c16, %c0_5] : memref<72x1152xf32, #tpu.memory_space<vmem>>, vector<8x1152xf32>
    tpu.vector_store %arg5[%c16, %c0_5], %7 {strides = array<i32>} : memref<72x1152xf32, #tpu.memory_space<vmem>>, vector<8x1152xf32>,
    %9 = vector.extract_strided_slice %2 {offsets = [0, 34], sizes = [8, 1152], strides = [1, 1]} : vector<8x1222xf32> to vector<8x1152xf32>
    %c24 = arith.constant 24 : index
    %c0_6 = arith.constant 0 : index
    %10 = vector.load %arg5[%c24, %c0_6] : memref<72x1152xf32, #tpu.memory_space<vmem>>, vector<8x1152xf32>
    tpu.vector_store %arg5[%c24, %c0_6], %9 {strides = array<i32>} : memref<72x1152xf32, #tpu.memory_space<vmem>>, vector<8x1152xf32>,
    %11 = vector.extract_strided_slice %2 {offsets = [0, 35], sizes = [8, 1152], strides = [1, 1]} : vector<8x1222xf32> to vector<8x1152xf32>
    %c32 = arith.constant 32 : index
    %c0_7 = arith.constant 0 : index
    %12 = vector.load %arg5[%c32, %c0_7] : memref<72x1152xf32, #tpu.memory_space<vmem>>, vector<8x1152xf32>
    tpu.vector_store %arg5[%c32, %c0_7], %11 {strides = array<i32>} : memref<72x1152xf32, #tpu.memory_space<vmem>>, vector<8x1152xf32>,
    %13 = vector.extract_strided_slice %2 {offsets = [0, 36], sizes = [8, 1152], strides = [1, 1]} : vector<8x1222xf32> to vector<8x1152xf32>
    %c40 = arith.constant 40 : index
    %c0_8 = arith.constant 0 : index
    %14 = vector.load %arg5[%c40, %c0_8] : memref<72x1152xf32, #tpu.memory_space<vmem>>, vector<8x1152xf32>
    tpu.vector_store %arg5[%c40, %c0_8], %13 {strides = array<i32>} : memref<72x1152xf32, #tpu.memory_space<vmem>>, vector<8x1152xf32>,
    %15 = vector.extract_strided_slice %2 {offsets = [0, 68], sizes = [8, 1152], strides = [1, 1]} : vector<8x1222xf32> to vector<8x1152xf32>
    %c48 = arith.constant 48 : index
    %c0_9 = arith.constant 0 : index
    %16 = vector.load %arg5[%c48, %c0_9] : memref<72x1152xf32, #tpu.memory_space<vmem>>, vector<8x1152xf32>
    tpu.vector_store %arg5[%c48, %c0_9], %15 {strides = array<i32>} : memref<72x1152xf32, #tpu.memory_space<vmem>>, vector<8x1152xf32>,
    %17 = vector.extract_strided_slice %2 {offsets = [0, 69], sizes = [8, 1152], strides = [1, 1]} : vector<8x1222xf32> to vector<8x1152xf32>
    %c56 = arith.constant 56 : index
    %c0_10 = arith.constant 0 : index
    %18 = vector.load %arg5[%c56, %c0_10] : memref<72x1152xf32, #tpu.memory_space<vmem>>, vector<8x1152xf32>
    tpu.vector_store %arg5[%c56, %c0_10], %17 {strides = array<i32>} : memref<72x1152xf32, #tpu.memory_space<vmem>>, vector<8x1152xf32>,
    %19 = vector.extract_strided_slice %2 {offsets = [0, 70], sizes = [8, 1152], strides = [1, 1]} : vector<8x1222xf32> to vector<8x1152xf32>
    %c64 = arith.constant 64 : index
    %c0_11 = arith.constant 0 : index
    %20 = vector.load %arg5[%c64, %c0_11] : memref<72x1152xf32, #tpu.memory_space<vmem>>, vector<8x1152xf32>
    tpu.vector_store %arg5[%c64, %c0_11], %19 {strides = array<i32>} : memref<72x1152xf32, #tpu.memory_space<vmem>>, vector<8x1152xf32>,
    %c0_12 = arith.constant 0 : index
    %c0_13 = arith.constant 0 : index
    %21 = vector.load %arg5[%c0_12, %c0_13] : memref<72x1152xf32, #tpu.memory_space<vmem>>, vector<72x1152xf32>
    %22 = arith.truncf %21 : vector<72x1152xf32> to vector<72x1152xbf16>
    %c0_14 = arith.constant 0 : index
    %c0_15 = arith.constant 0 : index
    %23 = vector.load %arg2[%c0_14, %c0_15] : memref<8x72xbf16, #tpu.memory_space<vmem>>, vector<8x72xbf16>
    %cst = arith.constant dense<0.000000e+00> : vector<8x1152xf32>
    %24 = tpu.matmul %23, %22, %cst {dimension_numbers = #tpu.dot_dimension_numbers<[1], [0], [0], [1], [0, 0, 1, 1], [], []>} : vector<8x72xbf16>, vector<72x1152xbf16>, vector<8x1152xf32> -> vector<8x1152xf32>
    %c0_16 = arith.constant 0 : index
    %c0_17 = arith.constant 0 : index
    %25 = vector.load %arg3[%c0_16, %c0_17] : memref<8x1xf32, #tpu.memory_space<vmem>>, vector<8x1xf32>
    %26 = vector.broadcast %25 : vector<8x1xf32> to vector<8x1152xf32>
    %27 = arith.addf %24, %26 : vector<8x1152xf32>
    %c0_18 = arith.constant 0 : index
    %c0_19 = arith.constant 0 : index
    %c0_20 = arith.constant 0 : index
    %28 = vector.load %arg4[%c0_18, %c0_19, %c0_20] : memref<1x8x1152xf32, #tpu.memory_space<vmem>>, vector<1x8x1152xf32>
    %29 = vector.shape_cast %28 : vector<1x8x1152xf32> to vector<8x1152xf32>
    %30 = vector.shape_cast %27 : vector<8x1152xf32> to vector<1x8x1152xf32>
    tpu.vector_store %arg4[%c0_18, %c0_19, %c0_20], %30 {strides = array<i32>} : memref<1x8x1152xf32, #tpu.memory_space<vmem>>, vector<1x8x1152xf32>,
    return
  }
  func.func @transform_0(%arg0: i32) -> (i32, i32, i32) {
    %c0_i32 = arith.constant 0 : i32
    %c0_i32_0 = arith.constant 0 : i32
    %c0_i32_1 = arith.constant 0 : i32
    return %arg0, %c0_i32, %c0_i32_0 : i32, i32, i32
  }
  func.func @transform_1(%arg0: i32) -> (i32, i32) {
    %c0_i32 = arith.constant 0 : i32
    %c0_i32_0 = arith.constant 0 : i32
    %c0_i32_1 = arith.constant 0 : i32
    return %c0_i32, %c0_i32_0 : i32, i32
  }
  func.func @transform_2(%arg0: i32) -> (i32, i32) {
    %c0_i32 = arith.constant 0 : i32
    %c0_i32_0 = arith.constant 0 : i32
    %c0_i32_1 = arith.constant 0 : i32
    return %c0_i32, %c0_i32_0 : i32, i32
  }
  func.func @transform_3(%arg0: i32) -> (i32, i32, i32) {
    %c0_i32 = arith.constant 0 : i32
    %c0_i32_0 = arith.constant 0 : i32
    %c0_i32_1 = arith.constant 0 : i32
    return %arg0, %c0_i32, %c0_i32_0 : i32, i32, i32
  }
}

</mosaic_0001>

<bundles_post_ra>
// kernel: upsample_conv_forward.1
= control target key start
LH: loop header
LB: loop body
LE: loop exit
PB: predicated region body
PF: predicated region fallthrough
CT: control target
= control target key end

     0   :  { %s1302_s12 = smov 0   ;;  %s1694_s0 = inlined_call_operand.vmem [shape: bf16[2,8,1222], index: 0, kind: input, shape index: {}]   ;;  %s1695_s1 = inlined_call_operand.vmem [shape: bf16[8,72], index: 1, kind: input, shape index: {}]   ;;  %s1696_s2 = inlined_call_operand.vmem [shape: f32[8,1], index: 2, kind: input, shape index: {}]   ;;  %s1697_s3 = inlined_call_operand.vmem [shape: f32[2,8,1152], index: 3, kind: output, shape index: {}]  }
   0x1 LB: > { %s1023_s13 = sadd.s32 4294967295, %s1269_s12   ;;  %p1027_p0 = scmp.ge.s32.totalorder %s1269_s12, 1  ;;  %s1269_s12 = sphi %s1302_s12, %s13_s12  }
   0x2   : > { %p137_p1 = scmp.lt.s32.totalorder %s1269_s12, 3 }
   0x4   : > { %p138_p2 = pnand %p1027_p0, %p137_p1 }
   0x5   : > { %p161_p3 = scmp.lt.s32.totalorder (!%p138_p2), %s1023_s13, 1  ;;  %s1271_s18 = smov (!%p138_p2), 60  }
   0x6   : > { %141 = sbr.rel (%p138_p2) target bundleno = 427 (0x1ab), region = 32  ;;  %s1272_s19 = smov (!%p138_p2), 58  }
   0x7   : > { %s1273_s20 = smov (!%p138_p2), 59   ;;  %s1274_s21 = smov (!%p138_p2), 92  }
   0x8   : > { %s1275_s22 = smov (!%p138_p2), 93   ;;  %s1276_s23 = smov (!%p138_p2), 94  }
   0x9   : > { %s1277_s24 = smov (!%p138_p2), 126   ;;  %s1279_s25 = smov (!%p138_p2), 127  }
   0xb   : > { %s1699_s13 = smov (!%p161_p3, %s1023_s13), 1  ;;  %v1278_v16 = vmov 0   ;;  %v717_v24 = vld [vmem:[%s1696_s2] sm:$0xff]  ;;  %vm562_vm0 = vcmask 474112   ;;  %vm466_vm1 = vcmask 490496   ;;  %vm514_vm2 = vcmask 482304  }
   0xc   : > { %s1061_s14 = smul.u32 40, %s1699_s13  ;;  %787 = vmatprep.mubr.bf16.mxu0 %v1278_v16  ;;  %828 = vmatprep.mubr.bf16.mxu1 %v1278_v16  ;;  %vm727_vm3 = vcmask 1043456   ;;  %vm370_vm4 = vcmask 760832   ;;  %vm418_vm5 = vcmask 752640   ;;  %vm274_vm6 = vcmask 1031168  }
   0xd   : > { %1262 = vset.pattern.permute.xlu0 %v1278_v16  ;;  %vm322_vm7 = vcmask 769024   ;;  %vm226_vm8 = vcmask 1039360   ;;  %vm723_vm9 = vcmask 588800   ;;  %vm1281_vm10 = vmmov 0   ;;  %s1062_s30 = smul.u32 72, %s1699_s13 }
   0xe   : > { %s1316_s17 = scalar_lea.vmem %s1694_s0, %s1061_s14 }
   0xf   : > { %v172_v0 = vld [vmem:[%s1316_s17] sm:$0xff]  ;;  %v173_v1 = vld [vmem:[%s1316_s17 + $0x8] sm:$0xff]  ;;  %v175_v10 = vld [vmem:[%s1316_s17 + $0x18] sm:$0xff]  ;;  %s1680_s6 = scalar_lea.vmem %s1697_s3, %s1062_s30 }
  0x10   : > { %v1320_v2 = vunpack.c.h.bf16 %v172_v0  ;;  %v1322_v3 = vunpack.c.l.bf16 %v173_v1  ;;  %v1324_v4 = vunpack.c.h.bf16 %v173_v1  ;;  %v1326_v5 = vunpack.c.l.bf16 %v172_v0  ;;  %v1350_v11 = vld [vmem:[%s1316_s17 + $0x10] sm:$0xff]  ;;  %v176_v19 = vld [vmem:[%s1316_s17 + $0x20] sm:$0xff] }
  0x11   : > { %v1352_v12 = vunpack.c.l.bf16 %v175_v10  ;;  %v1354_v13 = vunpack.c.h.bf16 %v175_v10  ;;  %v181_v14 = vunpack.c.l.bf16 %v1350_v11  ;;  %v182_v15 = vunpack.c.h.bf16 %v1350_v11 }
  0x12   : > { %v1092_v6 = vpack.i.bf16 %v1322_v3, %v1320_v2  ;;  %v1082_v7 = vpack.i.bf16 %v1320_v2, %v1326_v5  ;;  %v1087_v8 = vpack.i.bf16 %v1324_v4, %v1322_v3  ;;  %v1107_v9 = vpack.i.bf16 %v1324_v4, %v1326_v5 }
  0x13   : > { %v1167_v17 = vpack.i.bf16 %v1354_v13, %v1352_v12  ;;  %v1162_v18 = vpack.i.bf16 %v182_v15, %v181_v14  ;;  %v1389_v20 = vunpack.c.l.bf16 %v176_v19  ;;  %v186_v21 = vunpack.c.h.bf16 %v176_v19 }
  0x14   : > { %1093 = vrot.lane.b32.xlu1 %v1092_v6, %s1271_s18  ;;  %1083 = vrot.lane.b32.xlu0 %v1082_v7, %s1272_s19  ;;  %v1280_v11 = vmov 0.0  }
  0x15   : > { %v1227_v22 = vpack.i.bf16 %v186_v21, %v1389_v20  ;;  %v1242_v23 = vpack.i.bf16 %v1389_v20, %v1354_v13 }
  0x18   : > { %1098 = vrot.lane.b32.xlu1 %v1092_v6, %s1273_s20  ;;  %1088 = vrot.lane.b32.xlu0 %v1087_v8, %s1272_s19 }
  0x1c   : > { %1108 = vrot.lane.b32.xlu1 %v1107_v9, %s1273_s20  ;;  %1103 = vrot.lane.b32.xlu0 %v1107_v9, %s1271_s18 }
  0x20   : > { %1118 = vrot.lane.b32.xlu1 %v1092_v6, %s1274_s21  ;;  %1113 = vrot.lane.b32.xlu0 %v1092_v6, %s1275_s22 }
  0x24   : > { %1128 = vrot.lane.b32.xlu1 %v1107_v9, %s1274_s21  ;;  %1123 = vrot.lane.b32.xlu0 %v1107_v9, %s1275_s22 }
  0x28   : > { %1138 = vrot.lane.b32.xlu1 %v1092_v6, %s1276_s23  ;;  %1133 = vrot.lane.b32.xlu0 %v1092_v6, %s1277_s24 }
  0x2c   : > { %1148 = vrot.lane.b32.xlu1 %v1107_v9, %s1276_s23  ;;  %1143 = vrot.lane.b32.xlu0 %v1107_v9, %s1277_s24 }
  0x30   : > { %1158 = vrot.lane.b32.xlu1 %v1107_v9, %s1279_s25  ;;  %1153 = vrot.lane.b32.xlu0 %v1092_v6, %s1279_s25 }
  0x34   : > { %1168 = vrot.lane.b32.xlu1 %v1167_v17, %s1272_s19  ;;  %1163 = vrot.lane.b32.xlu0 %v1162_v18, %s1272_s19 }
  0x38   : > { %1178 = vrot.lane.b32.xlu1 %v1167_v17, %s1271_s18  ;;  %1173 = vrot.lane.b32.xlu0 %v1162_v18, %s1271_s18 }
  0x3c   : > { %1188 = vrot.lane.b32.xlu1 %v1167_v17, %s1273_s20  ;;  %1183 = vrot.lane.b32.xlu0 %v1162_v18, %s1273_s20 }
  0x40   : > { %1198 = vrot.lane.b32.xlu1 %v1167_v17, %s1275_s22  ;;  %1193 = vrot.lane.b32.xlu0 %v1162_v18, %s1275_s22 }
  0x44   : > { %410 = vrot.lane.b32.xlu1 %v1352_v12, %s1274_s21  ;;  %1203 = vrot.lane.b32.xlu0 %v1162_v18, %s1274_s21 }
  0x48   : > { %266 = vrot.lane.b32.xlu1 %v1352_v12, %s1277_s24  ;;  %1208 = vrot.lane.b32.xlu0 %v1162_v18, %s1277_s24 }
  0x4c   : > { %314 = vrot.lane.b32.xlu1 %v1352_v12, %s1276_s23  ;;  %1213 = vrot.lane.b32.xlu0 %v1162_v18, %s1276_s23 }
  0x50   : > { %218 = vrot.lane.b32.xlu1 %v1352_v12, %s1279_s25  ;;  %1218 = vrot.lane.b32.xlu0 %v1162_v18, %s1279_s25 }
  0x54   : > { %1228 = vrot.lane.b32.xlu1 %v1227_v22, %s1271_s18  ;;  %1223 = vrot.lane.b32.xlu0 %v1227_v22, %s1272_s19 }
  0x58   : > { %1238 = vrot.lane.b32.xlu1 %v1227_v22, %s1275_s22  ;;  %1233 = vrot.lane.b32.xlu0 %v1227_v22, %s1273_s20 }
  0x5c   : > { %416 = vrot.lane.b32.xlu1 %v186_v21, %s1274_s21  ;;  %1243 = vrot.lane.b32.xlu0 %v1242_v23, %s1274_s21 }
  0x60   : > { %1253 = vrot.lane.b32.xlu1 %v1242_v23, %s1276_s23  ;;  %1248 = vrot.lane.b32.xlu0 %v1242_v23, %s1277_s24 }
  0x64   : > { %320 = vrot.lane.b32.xlu1 %v186_v21, %s1276_s23  ;;  %272 = vrot.lane.b32.xlu0 %v186_v21, %s1277_s24 }
  0x68   : > { %1258 = vrot.lane.b32.xlu0 %v1242_v23, %s1279_s25  ;;  %224 = vrot.lane.b32.xlu1 %v186_v21, %s1279_s25 }
  0x6c   : > { %720 = vperm.xlu0 %1262, %v717_v24  }
  0x86   : > { %v1412_v25 = vpop.permute.xlu1 %1093  ;;  %v1084_v26 = vpop.permute.xlu0 %1083 }
  0x87   : > { %v1086_v27 = vunpack.i.h.bf16 %v1084_v26  ;;  %v1085_v28 = vunpack.i.l.bf16 %v1084_v26  ;;  %v1096_v29 = vunpack.i.h.bf16 %v1412_v25  ;;  %v1095_v30 = vunpack.i.l.bf16 %v1412_v25 }
  0x89   : > { %v563_v31 = vsel %vm562_vm0, %v1085_v28, %v1086_v27  ;;  %v468_v39 = vsel %vm466_vm1, %v1095_v30, %v1096_v29 }
  0x8a   : > { %v1417_v32 = vpop.permute.xlu1 %1098  ;;  %v1419_v33 = vpop.permute.xlu0 %1088  ;;  %v707_v37 = vpack.c.bf16 %v563_v31, %v563_v31 }
  0x8b   : > { %v1101_v34 = vunpack.i.h.bf16 %v1417_v32  ;;  %v1100_v35 = vunpack.i.l.bf16 %v1417_v32  ;;  %v1090_v36 = vunpack.i.l.bf16 %v1419_v33  ;;  %v1091_v28 = vunpack.i.h.bf16 %v1419_v33 }
  0x8c   : > { %v729_v46 = vsel %vm727_vm3, %v707_v37, 0 }
  0x8d   : > { %v564_v38 = vsel %vm562_vm0, %v1086_v27, %v1090_v36  ;;  %v516_v40 = vsel %vm514_vm2, %v1100_v35, %v1101_v34 }
  0x8e   : > { %v1433_v41 = vpop.permute.xlu1 %1108  ;;  %v1435_v42 = vpop.permute.xlu0 %1103  ;;  %v708_v43 = vpack.c.bf16 %v564_v38, %v564_v38  ;;  %v699_v47 = vpack.c.bf16 %v516_v40, %v468_v39 }
  0x8f   : > { %v1110_v44 = vunpack.i.l.bf16 %v1433_v41  ;;  %v1105_v45 = vunpack.i.l.bf16 %v1435_v42 }
  0x90   : > { %1030 = vmatprep.subr.msk.bf16.mxu0 %vm727_vm3, %v708_v43 }
  0x91   : > { %762 = vmatpush1.bf16.msra.mxu0 %v729_v46  ;;  %v467_v48 = vsel %vm466_vm1, %v1105_v45, %v1095_v30  ;;  %v515_v49 = vsel %vm514_vm2, %v1110_v44, %v1100_v35  ;;  %v565_v44 = vsel %vm562_vm0, %v1090_v36, %v1091_v28 }
  0x92   : > { %v1443_v50 = vpop.permute.xlu1 %1118  ;;  %v1445_v51 = vpop.permute.xlu0 %1113  ;;  %763 = vmatprep.subr.bf16.mxu0 %v699_v47  ;;  %v698_v52 = vpack.c.bf16 %v515_v49, %v467_v48  ;;  %v709_v33 = vpack.c.bf16 %v565_v44, %v565_v44 }
  0x93   : > { %v1121_v53 = vunpack.i.h.bf16 %v1443_v50  ;;  %v1120_v54 = vunpack.i.l.bf16 %v1443_v50  ;;  %v1116_v55 = vunpack.i.h.bf16 %v1445_v51  ;;  %v1115_v56 = vunpack.i.l.bf16 %v1445_v51 }
  0x95   : > { %764 = vmatpush1.bf16.msra.mxu0 %v698_v52  ;;  %v372_v57 = vsel %vm370_vm4, %v1115_v56, %v1116_v55  ;;  %v420_v58 = vsel %vm418_vm5, %v1120_v54, %v1121_v53 }
  0x96   : > { %v1457_v59 = vpop.permute.xlu1 %1128  ;;  %v1459_v60 = vpop.permute.xlu0 %1123  ;;  %v690_v61 = vpack.c.bf16 %v420_v58, %v372_v57 }
  0x97   : > { %v1130_v62 = vunpack.i.l.bf16 %v1457_v59  ;;  %v1125_v63 = vunpack.i.l.bf16 %v1459_v60 }
  0x98   : > { %765 = vmatprep.subr.bf16.mxu0 %v690_v61 }
  0x99   : > { %v371_v0 = vsel %vm370_vm4, %v1125_v63, %v1115_v56  ;;  %v419_v1 = vsel %vm418_vm5, %v1130_v62, %v1120_v54 }
  0x9a   : > { %v1465_v6 = vpop.permute.xlu1 %1138  ;;  %v1467_v7 = vpop.permute.xlu0 %1133  ;;  %v689_v8 = vpack.c.bf16 %v419_v1, %v371_v0  ;;  %v1518_v1 = vld [vmem:[%s1695_s1] sm:$0xf] }
  0x9b   : > { %v1141_v9 = vunpack.i.h.bf16 %v1465_v6  ;;  %v1140_v10 = vunpack.i.l.bf16 %v1465_v6  ;;  %v1136_v17 = vunpack.i.h.bf16 %v1467_v7  ;;  %v1135_v18 = vunpack.i.l.bf16 %v1467_v7 }
  0x9c   : > { %766 = vmatpush1.bf16.msra.mxu0 %v689_v8 }
  0x9d   : > { %v276_v19 = vsel %vm274_vm6, %v1135_v18, %v1136_v17  ;;  %v324_v21 = vsel %vm322_vm7, %v1140_v10, %v1141_v9 }
  0x9e   : > { %v1479_v22 = vpop.permute.xlu1 %1148  ;;  %v1481_v23 = vpop.permute.xlu0 %1143  ;;  %v681_v24 = vpack.c.bf16 %v324_v21, %v276_v19  ;;  %v735_v19 = vsel %vm727_vm3, %v709_v33, 0 }
  0x9f   : > { %v1150_v26 = vunpack.i.l.bf16 %v1479_v22  ;;  %v1145_v27 = vunpack.i.l.bf16 %v1481_v23  ;;  %v1151_v50 = vunpack.i.h.bf16 %v1479_v22 }
  0xa0   : > { %767 = vmatprep.subr.bf16.mxu0 %v681_v24 }
  0xa1   : > { %v275_v30 = vsel %vm274_vm6, %v1145_v27, %v1135_v18  ;;  %v323_v31 = vsel %vm322_vm7, %v1150_v26, %v1140_v10  ;;  %v1111_v10 = vunpack.i.h.bf16 %v1433_v41  ;;  %v325_v22 = vsel %vm322_vm7, %v1141_v9, %v1151_v50 }
  0xa2   : > { %v1488_v35 = vpop.permute.xlu1 %1158  ;;  %v1490_v37 = vpop.permute.xlu0 %1153  ;;  %v680_v38 = vpack.c.bf16 %v323_v31, %v275_v30 }
  0xa3   : > { %v1160_v39 = vunpack.i.l.bf16 %v1488_v35  ;;  %v1156_v40 = vunpack.i.h.bf16 %v1490_v37  ;;  %v1155_v43 = vunpack.i.l.bf16 %v1490_v37  ;;  %v517_v25 = vsel %vm514_vm2, %v1101_v34, %v1111_v10 }
  0xa4   : > { %768 = vmatpush1.bf16.msra.mxu0 %v680_v38 }
  0xa5   : > { %v228_v45 = vsel %vm226_vm8, %v1155_v43, %v1156_v40  ;;  %v227_v46 = vsel %vm226_vm8, %v1160_v39, %v1155_v43 }
  0xa6   : > { %v1502_v47 = vpop.permute.xlu1 %1168  ;;  %v1164_v48 = vpop.permute.xlu0 %1163  ;;  %v672_v49 = vpack.c.bf16 %v228_v45, %v1320_v2  ;;  %v671_v52 = vpack.c.bf16 %v227_v46, %v1326_v5  ;;  %v1106_v2 = vunpack.i.h.bf16 %v1435_v42 }
  0xa7   : > { %v1170_v54 = vunpack.i.l.bf16 %v1502_v47  ;;  %v1166_v56 = vunpack.i.h.bf16 %v1164_v48  ;;  %v1165_v57 = vunpack.i.l.bf16 %v1164_v48 }
  0xa8   : > { %769 = vmatprep.subr.bf16.mxu0 %v672_v49  ;;  %v469_v30 = vsel %vm466_vm1, %v1096_v29, %v1106_v2 }
  0xa9   : > { %v568_v36 = vsel %vm562_vm0, %v1166_v56, %v1170_v54  ;;  %770 = vmatpush1.bf16.msra.mxu0 %v671_v52  ;;  %v566_v58 = vsel %vm562_vm0, %v1091_v28, %v1165_v57  ;;  %v567_v61 = vsel %vm562_vm0, %v1165_v57, %v1166_v56 }
  0xaa   : > { %v712_v62 = vpack.c.bf16 %v568_v36, %v568_v36  ;;  %v1513_v5 = vpop.permute.xlu1 %1178  ;;  %v1174_v63 = vpop.permute.xlu0 %1173  ;;  %v710_v0 = vpack.c.bf16 %v566_v58, %v566_v58  ;;  %v711_v8 = vpack.c.bf16 %v567_v61, %v567_v61  ;;  %v700_v58 = vpack.c.bf16 %v517_v25, %v469_v30 }
  0xab   : > { %v1181_v18 = vunpack.i.h.bf16 %v1513_v5  ;;  %v1180_v21 = vunpack.i.l.bf16 %v1513_v5  ;;  %v1176_v42 = vunpack.i.h.bf16 %v1174_v63  ;;  %v1175_v24 = vunpack.i.l.bf16 %v1174_v63 }
  0xac   : > { %1032 = vmatprep.subr.msk.bf16.mxu1 %vm727_vm3, %v710_v0  ;;  %1034 = vmatprep.subr.msk.bf16.mxu0 %vm727_vm3, %v712_v62  ;;  %v741_v26 = vsel %vm727_vm3, %v711_v8, 0  ;;  %v1131_v61 = vunpack.i.h.bf16 %v1457_v59 }
  0xad   : > { %1031 = vmatmul.mubr.msk.bf16.vlgmr.msra.gmra.mxu0 %vm723_vm9, %v1518_v1  ;;  %803 = vmatpush1.bf16.msra.mxu1 %v735_v19  ;;  %v1532_v41 = vsel %vm466_vm1, %v1180_v21, %v1181_v18  ;;  %v471_v44 = vsel %vm466_vm1, %v1175_v24, %v1176_v42  ;;  %v470_v45 = vsel %vm466_vm1, %v1106_v2, %v1175_v24  ;;  %v1126_v2 = vunpack.i.h.bf16 %v1459_v60 }
  0xae   : > { %844 = vmatpush1.bf16.msra.mxu0 %v741_v26  ;;  %v1534_v27 = vpop.permute.xlu1 %1188  ;;  %v1184_v28 = vpop.permute.xlu0 %1183  ;;  %869 = vmatprep.mubr.bf16.mxu0 %v1278_v16  ;;  %v472_v46 = vsel %vm466_vm1, %v1176_v42, %v1180_v21  ;;  %v421_v60 = vsel %vm418_vm5, %v1121_v53, %v1131_v61  ;;  %v1146_v53 = vunpack.i.h.bf16 %v1481_v23  ;;  %v1161_v23 = vunpack.i.h.bf16 %v1488_v35 }
  0xaf   : > { %v1191_v31 = vunpack.i.h.bf16 %v1534_v27  ;;  %v1190_v38 = vunpack.i.l.bf16 %v1534_v27  ;;  %v1186_v39 = vunpack.i.h.bf16 %v1184_v28  ;;  %v1185_v43 = vunpack.i.l.bf16 %v1184_v28 }
  0xb0   : > { %v373_v59 = vsel %vm370_vm4, %v1116_v55, %v1126_v2 }
  0xb1   : > { %v1551_v29 = vsel %vm514_vm2, %v1190_v38, %v1191_v31  ;;  %v519_v48 = vsel %vm514_vm2, %v1185_v43, %v1186_v39  ;;  %v518_v49 = vsel %vm514_vm2, %v1111_v10, %v1185_v43  ;;  %v520_v52 = vsel %vm514_vm2, %v1186_v39, %v1190_v38 }
  0xb2   : > { %v704_v56 = vpack.c.bf16 %v1551_v29, %v1532_v41  ;;  %v702_v57 = vpack.c.bf16 %v519_v48, %v471_v44  ;;  %v1558_v33 = vpop.permute.xlu1 %1198  ;;  %v1194_v32 = vpop.permute.xlu0 %1193  ;;  %v701_v36 = vpack.c.bf16 %v518_v49, %v470_v45  ;;  %v703_v34 = vpack.c.bf16 %v520_v52, %v472_v46 }
  0xb3   : > { %v1196_v62 = vunpack.i.h.bf16 %v1194_v32  ;;  %v1195_v63 = vunpack.i.l.bf16 %v1194_v32  ;;  %v1200_v0 = vunpack.i.l.bf16 %v1558_v33  ;;  %v691_v45 = vpack.c.bf16 %v421_v60, %v373_v59 }
  0xb4   : > { %804 = vmatprep.subr.bf16.mxu1 %v701_v36  ;;  %845 = vmatprep.subr.bf16.mxu0 %v703_v34  ;;  %v277_v32 = vsel %vm274_vm6, %v1136_v17, %v1146_v53  ;;  %v1171_v36 = vunpack.i.h.bf16 %v1502_v47 }
  0xb5   : > { %805 = vmatpush1.bf16.msra.mxu1 %v700_v58  ;;  %846 = vmatpush1.bf16.msra.mxu0 %v702_v57  ;;  %v375_v42 = vsel %vm370_vm4, %v1195_v63, %v1196_v62  ;;  %v374_v24 = vsel %vm370_vm4, %v1126_v2, %v1195_v63  ;;  %v376_v30 = vsel %vm370_vm4, %v1196_v62, %v1200_v0 }
  0xb6   : > { %v1563_v8 = vpop.permute.xlu1 %410  ;;  %v1204_v10 = vpop.permute.xlu0 %1203 }
  0xb7   : > { %v1206_v19 = vunpack.i.h.bf16 %v1204_v10  ;;  %v1205_v21 = vunpack.i.l.bf16 %v1204_v10 }
  0xb9   : > { %v423_v26 = vsel %vm418_vm5, %v1205_v21, %v1206_v19  ;;  %v422_v28 = vsel %vm418_vm5, %v1131_v61, %v1205_v21  ;;  %v424_v38 = vsel %vm418_vm5, %v1206_v19, %v1563_v8  ;;  %v682_v21 = vpack.c.bf16 %v325_v22, %v277_v32 }
  0xba   : > { %v693_v39 = vpack.c.bf16 %v423_v26, %v375_v42  ;;  %v1580_v43 = vpop.permute.xlu1 %266  ;;  %v1209_v51 = vpop.permute.xlu0 %1208  ;;  %v692_v55 = vpack.c.bf16 %v422_v28, %v374_v24  ;;  %v694_v44 = vpack.c.bf16 %v424_v38, %v376_v30  ;;  %v229_v42 = vsel %vm226_vm8, %v1156_v40, %v1161_v23 }
  0xbb   : > { %v1211_v46 = vunpack.i.h.bf16 %v1209_v51  ;;  %v1210_v25 = vunpack.i.l.bf16 %v1209_v51  ;;  %v569_v24 = vsel %vm562_vm0, %v1170_v54, %v1171_v36  ;;  %v673_v51 = vpack.c.bf16 %v229_v42, %v1322_v3 }
  0xbc   : > { %806 = vmatprep.subr.bf16.mxu1 %v692_v55  ;;  %847 = vmatprep.subr.bf16.mxu0 %v694_v44  ;;  %v713_v55 = vpack.c.bf16 %v569_v24, %v569_v24 }
  0xbd   : > { %807 = vmatpush1.bf16.msra.mxu1 %v691_v45  ;;  %848 = vmatpush1.bf16.msra.mxu0 %v693_v39  ;;  %v279_v34 = vsel %vm274_vm6, %v1210_v25, %v1211_v46  ;;  %v278_v58 = vsel %vm274_vm6, %v1146_v53, %v1210_v25  ;;  %v280_v7 = vsel %vm274_vm6, %v1211_v46, %v1580_v43 }
  0xbe   : > { %v1584_v48 = vpop.permute.xlu1 %314  ;;  %v1214_v49 = vpop.permute.xlu0 %1213 }
  0xbf   : > { %v1216_v52 = vunpack.i.h.bf16 %v1214_v49  ;;  %v1215_v57 = vunpack.i.l.bf16 %v1214_v49 }
  0xc1   : > { %v327_v61 = vsel %vm322_vm7, %v1215_v57, %v1216_v52  ;;  %v326_v2 = vsel %vm322_vm7, %v1151_v50, %v1215_v57  ;;  %v328_v6 = vsel %vm322_vm7, %v1216_v52, %v1584_v48  ;;  %v1201_v52 = vunpack.i.h.bf16 %v1558_v33 }
  0xc2   : > { %v684_v17 = vpack.c.bf16 %v327_v61, %v279_v34  ;;  %v1602_v9 = vpop.permute.xlu1 %218  ;;  %v1219_v35 = vpop.permute.xlu0 %1218  ;;  %v683_v62 = vpack.c.bf16 %v326_v2, %v278_v58  ;;  %v685_v63 = vpack.c.bf16 %v328_v6, %v280_v7  ;;  %v747_v57 = vsel %vm727_vm3, %v713_v55, 0 }
  0xc3   : > { %v1221_v10 = vunpack.i.h.bf16 %v1219_v35  ;;  %v1220_v19 = vunpack.i.l.bf16 %v1219_v35  ;;  %v377_v5 = vsel %vm370_vm4, %v1200_v0, %v1201_v52 }
  0xc4   : > { %808 = vmatprep.subr.bf16.mxu1 %v683_v62  ;;  %849 = vmatprep.subr.bf16.mxu0 %v685_v63 }
  0xc5   : > { %v231_v59 = vsel %vm226_vm8, %v1220_v19, %v1221_v10  ;;  %809 = vmatpush1.bf16.msra.mxu1 %v682_v21  ;;  %850 = vmatpush1.bf16.msra.mxu0 %v684_v17  ;;  %v230_v60 = vsel %vm226_vm8, %v1161_v23, %v1220_v19  ;;  %v232_v26 = vsel %vm226_vm8, %v1221_v10, %v1602_v9 }
  0xc6   : > { %v675_v28 = vpack.c.bf16 %v231_v59, %v181_v14  ;;  %v1229_v30 = vpop.permute.xlu1 %1228  ;;  %v1224_v37 = vpop.permute.xlu0 %1223  ;;  %v674_v40 = vpack.c.bf16 %v230_v60, %v1324_v4  ;;  %v676_v47 = vpack.c.bf16 %v232_v26, %v182_v15 }
  0xc7   : > { %v1231_v54 = vunpack.i.h.bf16 %v1229_v30  ;;  %v1226_v38 = vunpack.i.h.bf16 %v1224_v37  ;;  %v1225_v39 = vunpack.i.l.bf16 %v1224_v37  ;;  %v1230_v44 = vunpack.i.l.bf16 %v1229_v30 }
  0xc8   : > { %810 = vmatprep.subr.bf16.mxu1 %v674_v40  ;;  %851 = vmatprep.subr.bf16.mxu0 %v676_v47 }
  0xc9   : > { %v570_v50 = vsel %vm562_vm0, %v1171_v36, %v1225_v39  ;;  %811 = vmatpush1.bf16.msra.mxu1 %v673_v51  ;;  %852 = vmatpush1.bf16.msra.mxu0 %v675_v28  ;;  %v571_v14 = vsel %vm562_vm0, %v1225_v39, %v1226_v38  ;;  %v475_v46 = vsel %vm466_vm1, %v1230_v44, %v1231_v54 }
  0xca   : > { %v714_v53 = vpack.c.bf16 %v570_v50, %v570_v50  ;;  %v1239_v4 = vpop.permute.xlu1 %1238  ;;  %v1234_v45 = vpop.permute.xlu0 %1233  ;;  %1047 = vmatprep.subr.bf16.mxu0 %v1280_v11  ;;  %v715_v15 = vpack.c.bf16 %v571_v14, %v571_v14  ;;  %v474_v36 = vsel %vm466_vm1, %v1181_v18, %v1230_v44 }
  0xcb   : > { %v1241_v3 = vunpack.i.h.bf16 %v1239_v4  ;;  %v1236_v25 = vunpack.i.h.bf16 %v1234_v45  ;;  %v1235_v49 = vunpack.i.l.bf16 %v1234_v45  ;;  %v1240_v22 = vunpack.i.l.bf16 %v1239_v4 }
  0xcc   : > { %1033 = vmatmul.mubr.msk.bf16.vlgmr.msra.gmra.mxu1 %vm723_vm9, %v1518_v1  ;;  %1035 = vmatmul.mubr.msk.bf16.vlgmr.msra.gmra.mxu0 %vm723_vm9, %v1518_v1  ;;  %v753_v32 = vsel %vm727_vm3, %v715_v15, 0 }
  0xcd   : > { %v523_v23 = vsel %vm514_vm2, %v1235_v49, %v1236_v25  ;;  %1036 = vmatprep.subr.msk.bf16.mxu1 %vm727_vm3, %v714_v53  ;;  %1048 = vmatpush3.bf16.msra.mxu0 %v753_v32  ;;  %v522_v34 = vsel %vm514_vm2, %v1191_v31, %v1235_v49  ;;  %v379_v6 = vsel %vm370_vm4, %v1240_v22, %v1241_v3 }
  0xce   : > { %v706_v58 = vpack.c.bf16 %v523_v23, %v475_v46  ;;  %885 = vmatpush1.bf16.msra.mxu1 %v747_v57  ;;  %v417_v61 = vpop.permute.xlu1 %416  ;;  %v1244_v2 = vpop.permute.xlu0 %1243  ;;  %v705_v7 = vpack.c.bf16 %v522_v34, %v474_v36  ;;  %1049 = vmatprep.subr.bf16.mxu0 %v1280_v11  ;;  %v378_v31 = vsel %vm370_vm4, %v1201_v52, %v1240_v22 }
  0xcf   : > { %v1246_v17 = vunpack.i.h.bf16 %v1244_v2  ;;  %v1245_v35 = vunpack.i.l.bf16 %v1244_v2  ;;  %1057 = vmatprep.mubr.msk.bf16.mxu0 %vm1281_vm10, %v1280_v11  ;;  %910 = vmatprep.mubr.bf16.mxu1 %v1278_v16 }
  0xd0   : > { %886 = vmatprep.subr.bf16.mxu1 %v705_v7 }
  0xd1   : > { %v427_v18 = vsel %vm418_vm5, %v1246_v17, %v417_v61  ;;  %v425_v27 = vsel %vm418_vm5, %v1563_v8, %v1245_v35  ;;  %1050 = vmatpush3.bf16.msra.mxu0 %v706_v58  ;;  %v426_v62 = vsel %vm418_vm5, %v1245_v35, %v1246_v17 }
  0xd2   : > { %v697_v63 = vpack.c.bf16 %v427_v18, %v379_v6  ;;  %v695_v10 = vpack.c.bf16 %v425_v27, %v377_v5  ;;  %887 = vmatpush1.bf16.msra.mxu1 %v704_v56  ;;  %v1254_v16 = vpop.permute.xlu1 %1253  ;;  %v1249_v33 = vpop.permute.xlu0 %1248  ;;  %v696_v0 = vpack.c.bf16 %v426_v62, %v378_v31  ;;  %1051 = vmatprep.subr.bf16.mxu0 %v1280_v11 }
  0xd3   : > { %v1256_v19 = vunpack.i.h.bf16 %v1254_v16  ;;  %v1255_v21 = vunpack.i.l.bf16 %v1254_v16  ;;  %v1251_v42 = vunpack.i.h.bf16 %v1249_v33  ;;  %v1250_v8 = vunpack.i.l.bf16 %v1249_v33 }
  0xd4   : > { %888 = vmatprep.subr.bf16.mxu1 %v696_v0 }
  0xd5   : > { %v329_v24 = vsel %vm322_vm7, %v1584_v48, %v1255_v21  ;;  %v281_v59 = vsel %vm274_vm6, %v1580_v43, %v1250_v8  ;;  %1052 = vmatpush3.bf16.msra.mxu0 %v697_v63  ;;  %v282_v41 = vsel %vm274_vm6, %v1250_v8, %v1251_v42  ;;  %v330_v29 = vsel %vm322_vm7, %v1255_v21, %v1256_v19 }
  0xd6   : > { %v686_v56 = vpack.c.bf16 %v329_v24, %v281_v59  ;;  %889 = vmatpush1.bf16.msra.mxu1 %v695_v10  ;;  %v321_v60 = vpop.permute.xlu1 %320  ;;  %v273_v26 = vpop.permute.xlu0 %272  ;;  %v687_v28 = vpack.c.bf16 %v330_v29, %v282_v41  ;;  %1053 = vmatprep.subr.bf16.mxu0 %v1280_v11 }
  0xd7   : > { %v331_v30 = vsel %vm322_vm7, %v1256_v19, %v321_v60  ;;  %v283_v37 = vsel %vm274_vm6, %v1251_v42, %v273_v26 }
  0xd8   : > { %v688_v48 = vpack.c.bf16 %v331_v30, %v283_v37  ;;  %890 = vmatprep.subr.bf16.mxu1 %v687_v28 }
  0xda   : > { %891 = vmatpush1.bf16.msra.mxu1 %v686_v56  ;;  %v1259_v43 = vpop.permute.xlu0 %1258  ;;  %1054 = vmatpush3.bf16.msra.mxu0 %v688_v48  ;;  %v225_v40 = vpop.permute.xlu1 %224 }
  0xdb   : > { %v1261_v47 = vunpack.i.h.bf16 %v1259_v43  ;;  %v1260_v54 = vunpack.i.l.bf16 %v1259_v43  ;;  %1055 = vmatprep.subr.bf16.mxu0 %v1280_v11 }
  0xdd   : > { %v233_v38 = vsel %vm226_vm8, %v1602_v9, %v1260_v54  ;;  %v235_v39 = vsel %vm226_vm8, %v1261_v47, %v225_v40  ;;  %v234_v51 = vsel %vm226_vm8, %v1260_v54, %v1261_v47 }
  0xde   : > { %v677_v55 = vpack.c.bf16 %v233_v38, %v1352_v12  ;;  %v679_v44 = vpack.c.bf16 %v235_v39, %v1389_v20  ;;  %v678_v50 = vpack.c.bf16 %v234_v51, %v1354_v13 }
  0xe0   : > { %892 = vmatprep.subr.bf16.mxu1 %v678_v50  ;;  %1056 = vmatpush3.bf16.msra.mxu0 %v679_v44 }
  0xe1   : > { %893 = vmatpush1.bf16.msra.mxu1 %v677_v55 }
  0xe3   : > { %1058 = vmatmul.mubr.msk.bf16.vlgmr.msra.gmra.mxu0 %vm723_vm9, %v1518_v1 }
  0xe4   : > { %1037 = vmatmul.mubr.msk.bf16.vlgmr.msra.gmra.mxu1 %vm723_vm9, %v1518_v1 }
  0xe7   : > { %v721_v9 = vpop.permute.xlu0 %720 }
 0x16d   : > { %v789_v14 = vpop.f32.mrf.mxu0 }
 0x16e   : > { %v790_v12 = vadd.f32 %v789_v14, %v721_v9 }
 0x16f   : > { %v791_v13 = vpop.f32.mrf.mxu0 }
 0x170   : > { %v792_v20 = vadd.f32 %v791_v13, %v721_v9  ;;  %959 = vst [vmem:[%s1680_s6] sm:$0xff] %v790_v12 }
 0x171   : > { %v793_v53 = vpop.f32.mrf.mxu0 }
 0x172   : > { %960 = vst [vmem:[%s1680_s6 + $0x8] sm:$0xff] %v792_v20 }
 0x173   : > { %v794_v1 = vpop.f32.mrf.mxu0 }
 0x18c   : > { %v830_v4 = vpop.f32.mrf.mxu1  ;;  %v871_v45 = vpop.f32.mrf.mxu0 }
 0x18d   : > { %v831_v11 = vadd.f32 %v830_v4, %v721_v9  ;;  %v872_v15 = vadd.f32 %v871_v45, %v721_v9 }
 0x18e   : > { %v832_v46 = vpop.f32.mrf.mxu1  ;;  %v873_v3 = vpop.f32.mrf.mxu0 }
 0x18f   : > { %961 = vst [vmem:[%s1680_s6 + $0x10] sm:$0xff] %v831_v11  ;;  %963 = vst [vmem:[%s1680_s6 + $0x20] sm:$0xff] %v872_v15  ;;  %v833_v25 = vadd.f32 %v832_v46, %v721_v9  ;;  %v874_v49 = vadd.f32 %v873_v3, %v721_v9 }
 0x190   : > { %v834_v52 = vpop.f32.mrf.mxu1  ;;  %v875_v57 = vpop.f32.mrf.mxu0 }
 0x191   : > { %962 = vst [vmem:[%s1680_s6 + $0x18] sm:$0xff] %v833_v25  ;;  %964 = vst [vmem:[%s1680_s6 + $0x28] sm:$0xff] %v874_v49 }
 0x192   : > { %v835_v32 = vpop.f32.mrf.mxu1  ;;  %v876_v22 = vpop.f32.mrf.mxu0 }
 0x1a3   : > { %v953_v23 = vpop.f32.mrf.mxu0 }
 0x1a4   : > { %v954_v36 = vadd.f32 %v953_v23, %v721_v9  ;;  %v912_v34 = vpop.f32.mrf.mxu1 }
 0x1a5   : > { %v913_v58 = vadd.f32 %v912_v34, %v721_v9  ;;  %v1059_v61 = vpop.f32.mrf.mxu0 }
 0x1a6   : > { %967 = vst [vmem:[%s1680_s6 + $0x40] sm:$0xff] %v954_v36  ;;  %v914_v2 = vpop.f32.mrf.mxu1 }
 0x1a7   : > { %965 = vst [vmem:[%s1680_s6 + $0x30] sm:$0xff] %v913_v58  ;;  %v915_v7 = vadd.f32 %v914_v2, %v721_v9  ;;  %v956_v6 = vpop.f32.mrf.mxu0 }
 0x1a8   : > { %v916_v17 = vpop.f32.mrf.mxu1 }
 0x1a9   : > { %966 = vst [vmem:[%s1680_s6 + $0x38] sm:$0xff] %v915_v7  ;;  %v1060_v35 = vpop.f32.mrf.mxu0 }
 0x1aa   : > { %v917_v5 = vpop.f32.mrf.mxu1 }
 0x1ab PF: > { %s13_s12 = sadd.s32 1, %s1269_s12  }
 0x1ac   : > { %p10_p4 = scmp.ge.s32.totalorder %s13_s12, 4  }
 0x1ae   :  { %12 = sbr.rel (!%p10_p4) target bundleno = 1 (0x1), region = 62 }

</bundles_post_ra>
